<compile_context>
chip_gen: v5e
topology: v5e:2x2
jax: 0.10.0
libtpu: 0.0.40
codegen_flags: <defaults>
</compile_context>

<pallas_src>
import functools

import jax
import jax.numpy as jnp
from jax.experimental import pallas as pl
from jax.experimental.pallas import tpu as pltpu

_LANE = 128
_ROW_PACK = 16          # bf16 packs 16 rows per sublane group
_TILE_B_MAX = 1024      # large enough to amortize step overhead, safe for v5e VMEM


def _round_up(n, m):
    return ((n + m - 1) // m) * m


def _choose_tiling(batch):
    """Pick (tile_b, b_pad) so that tile_b <= _TILE_B_MAX, tile_b % 16 == 0,
    b_pad % tile_b == 0, and the grid has >= 2 steps whenever the batch is big
    enough (keeps both v7x TensorCores busy)."""
    b16 = _round_up(max(batch, _ROW_PACK), _ROW_PACK)
    if b16 <= 2 * _ROW_PACK:
        return b16, b16                      # tiny batch: single step
    tile_b = min(_TILE_B_MAX, _round_up(pl.cdiv(b16, 2), _ROW_PACK))
    b_pad = _round_up(b16, tile_b)
    return tile_b, b_pad


def _mlp_kernel(x_ref,
                w1_ref, b1_ref,
                w2_ref, b2_ref,
                w3_ref, b3_ref,
                w4_ref, b4_ref,
                o_ref):
    """Fused MLP: 3x (Linear + ReLU) + final Linear for one batch tile.

    Dots run on the MXU with bf16 inputs / f32 accumulation; bias-add + ReLU run
    on the VPU in f32.  x arrives f32 and is cast to bf16 in-kernel.  Output is
    bf16, lane-padded to 128 columns so the writeback is unmasked full-vreg.
    """
    h = x_ref[...].astype(jnp.bfloat16)      # [TILE_B, F] bf16

    # Layer 1: Linear(F -> 64) + ReLU
    h = jnp.dot(h, w1_ref[...], preferred_element_type=jnp.float32) + b1_ref[...]
    h = jnp.maximum(h, 0.0).astype(jnp.bfloat16)

    # Layer 2: Linear(64 -> 128) + ReLU
    h = jnp.dot(h, w2_ref[...], preferred_element_type=jnp.float32) + b2_ref[...]
    h = jnp.maximum(h, 0.0).astype(jnp.bfloat16)

    # Layer 3: Linear(128 -> 256) + ReLU
    h = jnp.dot(h, w3_ref[...], preferred_element_type=jnp.float32) + b3_ref[...]
    h = jnp.maximum(h, 0.0).astype(jnp.bfloat16)

    # Output layer: Linear(256 -> num_class, lane-padded to 128), no activation
    out = jnp.dot(h, w4_ref[...], preferred_element_type=jnp.float32) + b4_ref[...]
    o_ref[...] = out.astype(o_ref.dtype)


def prepare_params(params):
    """One-time (outside the hot path) preprocessing of the Linear params:
    bf16 weight casts and lane-padding of the final layer to a multiple of 128.
    Weights are stored [in, out]; biases [1, out]."""
    (w1, b1), (w2, b2), (w3, b3), (w4, b4) = params
    num_class = int(w4.shape[1])
    n_pad = _round_up(max(num_class, _LANE), _LANE)

    w4p = jnp.zeros((w4.shape[0], n_pad), jnp.bfloat16).at[:, :num_class].set(
        w4.astype(jnp.bfloat16))
    b4p = jnp.zeros((1, n_pad), jnp.float32).at[:, :num_class].set(
        b4.astype(jnp.float32))

    prepared = (w1.astype(jnp.bfloat16), b1.astype(jnp.float32),
                w2.astype(jnp.bfloat16), b2.astype(jnp.float32),
                w3.astype(jnp.bfloat16), b3.astype(jnp.float32),
                w4p, b4p)
    prepared = jax.tree_util.tree_map(jax.block_until_ready, prepared)
    return prepared, num_class


@functools.partial(jax.jit, static_argnames=("num_class",))
def mlp_forward(x, prepared, num_class):
    """x: [B, label_len, seq_len] float32.  prepared: output of prepare_params.
    Returns [B, 1, num_class] float32 (matches torch forward: view -> MLP -> unsqueeze(1))."""
    B = x.shape[0]
    F = x.shape[1] * x.shape[2]
    x2d = x.reshape(B, F).astype(jnp.float32)   # matches torch x.view(x.size(0), -1)

    w1b, b1, w2b, b2, w3b, b3, w4p, b4p = prepared
    n_pad = w4p.shape[1]

    tile_b, b_pad = _choose_tiling(B)
    if b_pad != B:
        x2d = jnp.pad(x2d, ((0, b_pad - B), (0, 0)))

    operands = (x2d, w1b, b1, w2b, b2, w3b, b3, w4p, b4p)

    # x / out are tiled over the batch grid; weights & biases stay VMEM-resident
    # (constant block index -> DMA'd once, no re-fetch per grid step).
    x_spec = pl.BlockSpec((tile_b, F), lambda i: (i, 0))

    def _resident(shape):
        return pl.BlockSpec(shape, lambda i: (0, 0))

    in_specs = [x_spec] + [_resident(op.shape) for op in operands[1:]]
    out_spec = pl.BlockSpec((tile_b, n_pad), lambda i: (i, 0))

    flops = 2 * b_pad * (F * w1b.shape[1]
                         + w1b.shape[1] * w2b.shape[1]
                         + w2b.shape[1] * w3b.shape[1]
                         + w3b.shape[1] * n_pad)
    bytes_accessed = (sum(int(op.size) * op.dtype.itemsize for op in operands)
                      + b_pad * n_pad * 2)      # bf16 output writeback

    out = pl.pallas_call(
        _mlp_kernel,
        out_shape=jax.ShapeDtypeStruct((b_pad, n_pad), jnp.bfloat16),
        grid=(b_pad // tile_b,),
        in_specs=in_specs,
        out_specs=out_spec,
        compiler_params=pltpu.CompilerParams(
            dimension_semantics=("parallel",)),
        cost_estimate=pl.CostEstimate(
            flops=flops, transcendentals=0, bytes_accessed=bytes_accessed),
    )(*operands)

    # Drop batch/lane padding, cast logits back to f32, then x.unsqueeze(1).
    return out[:B, :num_class].astype(jnp.float32)[:, None, :]


def init_params(key, input_size, hidden_sizes, output_size):
    """Deterministic init mimicking nn.Linear default (uniform +/- 1/sqrt(fan_in)).

    Weights stored as [in, out] (transposed vs. PyTorch's [out, in]); biases as
    [1, out] so they broadcast cleanly inside the kernel."""
    sizes = [input_size] + list(hidden_sizes) + [output_size]
    params = []
    for i in range(len(sizes) - 1):
        fan_in, fan_out = sizes[i], sizes[i + 1]
        key, wk, bk = jax.random.split(key, 3)
        bound = 1.0 / (fan_in ** 0.5)
        w = jax.random.uniform(wk, (fan_in, fan_out), jnp.float32, -bound, bound)
        b = jax.random.uniform(bk, (1, fan_out), jnp.float32, -bound, bound)
        params.append((w, b))
    return tuple(params)


def reference_forward(x, params):
    """Plain-JAX reference with matching bf16-in / f32-accumulate math."""
    h = x.reshape(x.shape[0], -1).astype(jnp.bfloat16)
    (w1, b1), (w2, b2), (w3, b3), (w4, b4) = params

    def lin(h, w, b):
        return jnp.dot(h, w.astype(jnp.bfloat16),
                       preferred_element_type=jnp.float32) + b

    h = jnp.maximum(lin(h, w1, b1), 0.0).astype(jnp.bfloat16)
    h = jnp.maximum(lin(h, w2, b2), 0.0).astype(jnp.bfloat16)
    h = jnp.maximum(lin(h, w3, b3), 0.0).astype(jnp.bfloat16)
    h = lin(h, w4, b4)
    return h[:, None, :]


if __name__ == "__main__":
    # Small config consistent with the module:
    #   configs.label_len = 4, configs.seq_len = 8  -> input_size = 32
    #   configs.num_class = 5
    batch = 2
    label_len = 4
    seq_len = 8
    num_class = 5
    hidden_sizes = [64, 128, 256]
    input_size = label_len * seq_len

    key = jax.random.PRNGKey(0)
    key, xk = jax.random.split(key)
    x = jax.random.normal(xk, (batch, label_len, seq_len), dtype=jnp.float32)

    params = init_params(key, input_size, hidden_sizes, num_class)
    prepared, nc = prepare_params(params)      # one-time, outside the hot path

    y = mlp_forward(x, prepared, nc)
    y = jax.block_until_ready(y)

    assert y.shape == (batch, 1, num_class), y.shape

    y_ref = reference_forward(x, params)
    # Kernel output passes through a bf16 writeback; compare with a bf16-level tolerance.
    assert jnp.allclose(y, y_ref.astype(jnp.float32), atol=2e-2, rtol=2e-2), \
        "mismatch vs reference"

    print("KERNEL_OK")
</pallas_src>

<mosaic_0001>
module attributes {stable_mosaic.version = 11 : i64} {
  func.func @_mlp_kernel(%arg0: i32, %arg1: memref<16x32xf32, #tpu.memory_space<vmem>>, %arg2: memref<32x64xbf16, #tpu.memory_space<vmem>>, %arg3: memref<1x64xf32, #tpu.memory_space<vmem>>, %arg4: memref<64x128xbf16, #tpu.memory_space<vmem>>, %arg5: memref<1x128xf32, #tpu.memory_space<vmem>>, %arg6: memref<128x256xbf16, #tpu.memory_space<vmem>>, %arg7: memref<1x256xf32, #tpu.memory_space<vmem>>, %arg8: memref<256x128xbf16, #tpu.memory_space<vmem>>, %arg9: memref<1x128xf32, #tpu.memory_space<vmem>>, %arg10: memref<16x128xbf16, #tpu.memory_space<vmem>>) attributes {dimension_semantics = [#tpu.dimension_semantics<parallel>], iteration_bounds = array<i64: 1>, scalar_prefetch = 0 : i64, scratch_operands = 0 : i64, tpu.core_type = #tpu.core_type<tc>, window_params = [{transform_indices = @transform_0, window_bounds = array<i64: 16, 32>}, {pipeline_mode = #tpu.pipeline_mode<synchronous>, transform_indices = @transform_1, window_bounds = array<i64: 32, 64>}, {pipeline_mode = #tpu.pipeline_mode<synchronous>, transform_indices = @transform_2, window_bounds = array<i64: 1, 64>}, {pipeline_mode = #tpu.pipeline_mode<synchronous>, transform_indices = @transform_3, window_bounds = array<i64: 64, 128>}, {pipeline_mode = #tpu.pipeline_mode<synchronous>, transform_indices = @transform_4, window_bounds = array<i64: 1, 128>}, {pipeline_mode = #tpu.pipeline_mode<synchronous>, transform_indices = @transform_5, window_bounds = array<i64: 128, 256>}, {pipeline_mode = #tpu.pipeline_mode<synchronous>, transform_indices = @transform_6, window_bounds = array<i64: 1, 256>}, {pipeline_mode = #tpu.pipeline_mode<synchronous>, transform_indices = @transform_7, window_bounds = array<i64: 256, 128>}, {pipeline_mode = #tpu.pipeline_mode<synchronous>, transform_indices = @transform_8, window_bounds = array<i64: 1, 128>}, {transform_indices = @transform_9, window_bounds = array<i64: 16, 128>}]} {
    %c0 = arith.constant 0 : index
    %c0_0 = arith.constant 0 : index
    %0 = vector.load %arg1[%c0, %c0_0] : memref<16x32xf32, #tpu.memory_space<vmem>>, vector<16x32xf32>
    %1 = arith.truncf %0 : vector<16x32xf32> to vector<16x32xbf16>
    %c0_1 = arith.constant 0 : index
    %c0_2 = arith.constant 0 : index
    %2 = vector.load %arg2[%c0_1, %c0_2] : memref<32x64xbf16, #tpu.memory_space<vmem>>, vector<32x64xbf16>
    %cst = arith.constant dense<0.000000e+00> : vector<16x64xf32>
    %3 = tpu.matmul %1, %2, %cst {dimension_numbers = #tpu.dot_dimension_numbers<[1], [0], [0], [1], [0, 0, 1, 1], [], []>} : vector<16x32xbf16>, vector<32x64xbf16>, vector<16x64xf32> -> vector<16x64xf32>
    %c0_3 = arith.constant 0 : index
    %c0_4 = arith.constant 0 : index
    %4 = vector.load %arg3[%c0_3, %c0_4] : memref<1x64xf32, #tpu.memory_space<vmem>>, vector<1x64xf32>
    %5 = vector.broadcast %4 : vector<1x64xf32> to vector<16x64xf32>
    %6 = arith.addf %3, %5 : vector<16x64xf32>
    %cst_5 = arith.constant 0.000000e+00 : f32
    %7 = vector.broadcast %cst_5 : f32 to vector<16x64xf32>
    %8 = arith.maximumf %6, %7 : vector<16x64xf32>
    %9 = arith.truncf %8 : vector<16x64xf32> to vector<16x64xbf16>
    %c0_6 = arith.constant 0 : index
    %c0_7 = arith.constant 0 : index
    %10 = vector.load %arg4[%c0_6, %c0_7] : memref<64x128xbf16, #tpu.memory_space<vmem>>, vector<64x128xbf16>
    %cst_8 = arith.constant dense<0.000000e+00> : vector<16x128xf32>
    %11 = tpu.matmul %9, %10, %cst_8 {dimension_numbers = #tpu.dot_dimension_numbers<[1], [0], [0], [1], [0, 0, 1, 1], [], []>} : vector<16x64xbf16>, vector<64x128xbf16>, vector<16x128xf32> -> vector<16x128xf32>
    %c0_9 = arith.constant 0 : index
    %c0_10 = arith.constant 0 : index
    %12 = vector.load %arg5[%c0_9, %c0_10] : memref<1x128xf32, #tpu.memory_space<vmem>>, vector<1x128xf32>
    %13 = vector.broadcast %12 : vector<1x128xf32> to vector<16x128xf32>
    %14 = arith.addf %11, %13 : vector<16x128xf32>
    %cst_11 = arith.constant 0.000000e+00 : f32
    %15 = vector.broadcast %cst_11 : f32 to vector<16x128xf32>
    %16 = arith.maximumf %14, %15 : vector<16x128xf32>
    %17 = arith.truncf %16 : vector<16x128xf32> to vector<16x128xbf16>
    %c0_12 = arith.constant 0 : index
    %c0_13 = arith.constant 0 : index
    %18 = vector.load %arg6[%c0_12, %c0_13] : memref<128x256xbf16, #tpu.memory_space<vmem>>, vector<128x256xbf16>
    %cst_14 = arith.constant dense<0.000000e+00> : vector<16x256xf32>
    %19 = tpu.matmul %17, %18, %cst_14 {dimension_numbers = #tpu.dot_dimension_numbers<[1], [0], [0], [1], [0, 0, 1, 1], [], []>} : vector<16x128xbf16>, vector<128x256xbf16>, vector<16x256xf32> -> vector<16x256xf32>
    %c0_15 = arith.constant 0 : index
    %c0_16 = arith.constant 0 : index
    %20 = vector.load %arg7[%c0_15, %c0_16] : memref<1x256xf32, #tpu.memory_space<vmem>>, vector<1x256xf32>
    %21 = vector.broadcast %20 : vector<1x256xf32> to vector<16x256xf32>
    %22 = arith.addf %19, %21 : vector<16x256xf32>
    %cst_17 = arith.constant 0.000000e+00 : f32
    %23 = vector.broadcast %cst_17 : f32 to vector<16x256xf32>
    %24 = arith.maximumf %22, %23 : vector<16x256xf32>
    %25 = arith.truncf %24 : vector<16x256xf32> to vector<16x256xbf16>
    %c0_18 = arith.constant 0 : index
    %c0_19 = arith.constant 0 : index
    %26 = vector.load %arg8[%c0_18, %c0_19] : memref<256x128xbf16, #tpu.memory_space<vmem>>, vector<256x128xbf16>
    %cst_20 = arith.constant dense<0.000000e+00> : vector<16x128xf32>
    %27 = tpu.matmul %25, %26, %cst_20 {dimension_numbers = #tpu.dot_dimension_numbers<[1], [0], [0], [1], [0, 0, 1, 1], [], []>} : vector<16x256xbf16>, vector<256x128xbf16>, vector<16x128xf32> -> vector<16x128xf32>
    %c0_21 = arith.constant 0 : index
    %c0_22 = arith.constant 0 : index
    %28 = vector.load %arg9[%c0_21, %c0_22] : memref<1x128xf32, #tpu.memory_space<vmem>>, vector<1x128xf32>
    %29 = vector.broadcast %28 : vector<1x128xf32> to vector<16x128xf32>
    %30 = arith.addf %27, %29 : vector<16x128xf32>
    %31 = arith.truncf %30 : vector<16x128xf32> to vector<16x128xbf16>
    %c0_23 = arith.constant 0 : index
    %c0_24 = arith.constant 0 : index
    %32 = vector.load %arg10[%c0_23, %c0_24] : memref<16x128xbf16, #tpu.memory_space<vmem>>, vector<16x128xbf16>
    tpu.vector_store %arg10[%c0_23, %c0_24], %31 {strides = array<i32>} : memref<16x128xbf16, #tpu.memory_space<vmem>>, vector<16x128xbf16>,
    return
  }
  func.func @transform_0(%arg0: i32) -> (i32, i32) {
    %c0_i32 = arith.constant 0 : i32
    %c0_i32_0 = arith.constant 0 : i32
    return %arg0, %c0_i32 : i32, i32
  }
  func.func @transform_1(%arg0: i32) -> (i32, i32) {
    %c0_i32 = arith.constant 0 : i32
    %c0_i32_0 = arith.constant 0 : i32
    %c0_i32_1 = arith.constant 0 : i32
    return %c0_i32, %c0_i32_0 : i32, i32
  }
  func.func @transform_2(%arg0: i32) -> (i32, i32) {
    %c0_i32 = arith.constant 0 : i32
    %c0_i32_0 = arith.constant 0 : i32
    %c0_i32_1 = arith.constant 0 : i32
    return %c0_i32, %c0_i32_0 : i32, i32
  }
  func.func @transform_3(%arg0: i32) -> (i32, i32) {
    %c0_i32 = arith.constant 0 : i32
    %c0_i32_0 = arith.constant 0 : i32
    %c0_i32_1 = arith.constant 0 : i32
    return %c0_i32, %c0_i32_0 : i32, i32
  }
  func.func @transform_4(%arg0: i32) -> (i32, i32) {
    %c0_i32 = arith.constant 0 : i32
    %c0_i32_0 = arith.constant 0 : i32
    %c0_i32_1 = arith.constant 0 : i32
    return %c0_i32, %c0_i32_0 : i32, i32
  }
  func.func @transform_5(%arg0: i32) -> (i32, i32) {
    %c0_i32 = arith.constant 0 : i32
    %c0_i32_0 = arith.constant 0 : i32
    %c0_i32_1 = arith.constant 0 : i32
    return %c0_i32, %c0_i32_0 : i32, i32
  }
  func.func @transform_6(%arg0: i32) -> (i32, i32) {
    %c0_i32 = arith.constant 0 : i32
    %c0_i32_0 = arith.constant 0 : i32
    %c0_i32_1 = arith.constant 0 : i32
    return %c0_i32, %c0_i32_0 : i32, i32
  }
  func.func @transform_7(%arg0: i32) -> (i32, i32) {
    %c0_i32 = arith.constant 0 : i32
    %c0_i32_0 = arith.constant 0 : i32
    %c0_i32_1 = arith.constant 0 : i32
    return %c0_i32, %c0_i32_0 : i32, i32
  }
  func.func @transform_8(%arg0: i32) -> (i32, i32) {
    %c0_i32 = arith.constant 0 : i32
    %c0_i32_0 = arith.constant 0 : i32
    %c0_i32_1 = arith.constant 0 : i32
    return %c0_i32, %c0_i32_0 : i32, i32
  }
  func.func @transform_9(%arg0: i32) -> (i32, i32) {
    %c0_i32 = arith.constant 0 : i32
    %c0_i32_0 = arith.constant 0 : i32
    return %arg0, %c0_i32 : i32, i32
  }
}

</mosaic_0001>

<bundles_post_ra>
// kernel: mlp_forward.1
= control target key start
LH: loop header
LB: loop body
LE: loop exit
PB: predicated region body
PF: predicated region fallthrough
CT: control target
= control target key end

     0   :  { %14 = vsyncpa [#allocation3], 0  ;;  %s863_s0 = inlined_call_operand.vmem [shape: f32[16,32], index: 0, kind: input, shape index: {}]   ;;  %s864_s1 = inlined_call_operand.vmem [shape: bf16[32,64], index: 1, kind: input, shape index: {}]   ;;  %s865_s2 = inlined_call_operand.vmem [shape: f32[1,64], index: 2, kind: input, shape index: {}]   ;;  %s866_s3 = inlined_call_operand.hbm [shape: bf16[64,128], index: 3, kind: input, shape index: {}]   ;;  %s867_s4 = inlined_call_operand.vmem [shape: f32[1,128], index: 4, kind: input, shape index: {}]   ;;  %s868_s5 = inlined_call_operand.hbm [shape: bf16[128,256], index: 5, kind: input, shape index: {}]   ;;  %s869_s6 = inlined_call_operand.vmem [shape: f32[1,256], index: 6, kind: input, shape index: {}]   ;;  %s870_s7 = inlined_call_operand.hbm [shape: bf16[256,128], index: 7, kind: input, shape index: {}]   ;;  %s871_s8 = inlined_call_operand.vmem [shape: f32[1,128], index: 8, kind: input, shape index: {}]   ;;  %s872_s9 = inlined_call_operand.vmem [shape: bf16[16,128], index: 9, kind: output, shape index: {}]  }
   0x1   :  { %15 = vsyncpa [#allocation5], 0  ;;  %s41_s11 = sshll.u32 %s868_s5, 4  ;;  %s770_s12 = smov [#allocation4]   ;;  %s42_s11 = int_to_ptr.hbm [resolvable:$true] %s41_s11 }
   0x2   :  { %s43_s13 = sshll.u32 %s770_s12, 4  ;;  %s26_s16 = sshll.u32 %s866_s3, 4  ;;  %s44_s13 = int_to_ptr.vmem [resolvable:$true] %s43_s13  ;;  %s27_s16 = int_to_ptr.hbm [resolvable:$true] %s26_s16 }
   0x3   :  { %s771_s17 = smov 128   ;;  %s772_s18 = smov 8  }
   0x4   :  { %49 = dma.hbm_to_vmem [thread:$0]  %s42_s11, 2048, %s44_s13, [#allocation5], %s771_s17, %s771_s17, %s772_s18  }
   0x5   :  { %s773_s19 = smov [#allocation2]   ;;  %s774_s21 = smov 64  }
   0x6   :  { %s28_s20 = sshll.u32 %s773_s19, 4  ;;  %s775_s22 = smov 4   ;;  %s29_s20 = int_to_ptr.vmem [resolvable:$true] %s28_s20 }
   0x7   :  { %34 = dma.hbm_to_vmem [thread:$0]  %s27_s16, 512, %s29_s20, [#allocation3], %s774_s21, %s774_s21, %s775_s22  }
   0x8   :  { %s56_s24 = sshll.u32 %s870_s7, 4  ;;  %s776_s25 = smov [#allocation6]   ;;  %s57_s24 = int_to_ptr.hbm [resolvable:$true] %s56_s24 }
   0x9   :  { %s58_s26 = sshll.u32 %s776_s25, 4  ;;  %s59_s26 = int_to_ptr.vmem [resolvable:$true] %s58_s26 }
   0xa   :  { %64 = dma.hbm_to_vmem [thread:$0]  %s57_s24, 2048, %s59_s26, [#allocation5], %s774_s21, %s774_s21, %s775_s22  }
   0xb   :  { %766 = dma.done.wait [#allocation3], 512  }
   0xc   :  { %767 = vsyncadd [#allocation3], 4294966784 }
   0xd   :  { %768 = dma.done.wait [#allocation5], 4096  }
   0xe   :  { %769 = vsyncadd [#allocation5], 4294963200  ;;  %v642_v0 = vld [vmem:[%s864_s1 + $0x8] sm:$0xff]  ;;  %v641_v1 = vld [vmem:[%s864_s1] sm:$0xff]  ;;  %vm103_vm0 = vcmask 261120   ;;  %vm160_vm1 = vcmask 523264  }
   0xf   :  { %v80_v2 = vld [vmem:[%s863_s0] sm:$0xff]  ;;  %113 = vmatpush.bf16.msra.mxu0 %v642_v0  ;;  %v81_v3 = vld [vmem:[%s863_s0 + $0x8] sm:$0xff]  ;;  %v646_v5 = vld [vmem:[#allocation2 + $0x18] sm:$0xff] }
  0x10   :  { %v82_v4 = vpack.c.bf16 %v81_v3, %v80_v2  ;;  %168 = vmatpush.bf16.msra.mxu1 %v646_v5  ;;  %v645_v6 = vld [vmem:[#allocation2 + $0x10] sm:$0xff]  ;;  %v644_v7 = vld [vmem:[#allocation2 + $0x8] sm:$0xff]  ;;  %v643_v8 = vld [vmem:[#allocation2] sm:$0xff] }
  0x11   :  { %v571_v9 = vld [vmem:[#allocation4 + $0x70] sm:$0xf]  ;;  %v662_v10 = vld [vmem:[#allocation4 + $0x74] sm:$0xf0]  ;;  %v661_v11 = vld [vmem:[#allocation4 + $0x74] sm:$0xf] }
  0x12   :  { %v572_v12 = vor.u32 %v662_v10, %v571_v9  ;;  %v573_v13 = vld [vmem:[#allocation4 + $0x78] sm:$0xf0]  ;;  %v563_v14 = vld [vmem:[#allocation4 + $0x60] sm:$0xf]  ;;  %v660_v15 = vld [vmem:[#allocation4 + $0x64] sm:$0xf0] }
  0x13   :  { %114 = vmatpush.bf16.msra.mxu0 %v641_v1  ;;  %v576_v16 = vor.u32 %v661_v11, %v573_v13  ;;  %v659_v17 = vld [vmem:[#allocation4 + $0x64] sm:$0xf]  ;;  %v565_v18 = vld [vmem:[#allocation4 + $0x68] sm:$0xf0]  ;;  %v564_v19 = vor.u32 %v660_v15, %v563_v14  ;;  %v555_v21 = vld [vmem:[#allocation4 + $0x50] sm:$0xf] }
  0x14   :  { %169 = vmatpush.bf16.msra.mxu1 %v645_v6  ;;  %283 = vmatpush.bf16.msra.mxu2 %v572_v12  ;;  %v568_v20 = vor.u32 %v659_v17, %v565_v18  ;;  %v658_v22 = vld [vmem:[#allocation4 + $0x54] sm:$0xf0]  ;;  %v657_v23 = vld [vmem:[#allocation4 + $0x54] sm:$0xf]  ;;  %v557_v24 = vld [vmem:[#allocation4 + $0x58] sm:$0xf0] }
  0x15   :  { %297 = vmatpush.bf16.msra.mxu3 %v576_v16  ;;  %v556_v25 = vor.u32 %v658_v22, %v555_v21  ;;  %v560_v26 = vor.u32 %v657_v23, %v557_v24  ;;  %v547_v27 = vld [vmem:[#allocation4 + $0x40] sm:$0xf]  ;;  %v656_v28 = vld [vmem:[#allocation4 + $0x44] sm:$0xf0]  ;;  %v655_v29 = vld [vmem:[#allocation4 + $0x44] sm:$0xf] }
  0x16   :  { %495 = vmatmul.msk.bf16.vlgmr.msra.gmra.mxu0 %vm103_vm0, %v82_v4  ;;  %v549_v30 = vld [vmem:[#allocation4 + $0x48] sm:$0xf0]  ;;  %v548_v31 = vor.u32 %v656_v28, %v547_v27  ;;  %v691_v34 = vld [vmem:[%s865_s2] ss:$0 sm:$0xff]  ;;  %v539_v41 = vld [vmem:[#allocation4 + $0x30] sm:$0xf] }
  0x17   :  { %v552_v32 = vor.u32 %v655_v29, %v549_v30  ;;  %v654_v42 = vld [vmem:[#allocation4 + $0x34] sm:$0xf0]  ;;  %v653_v43 = vld [vmem:[#allocation4 + $0x34] sm:$0xf]  ;;  %v541_v45 = vld [vmem:[#allocation4 + $0x38] sm:$0xf0] }
  0x18   :  { %170 = vmatpush.bf16.msra.mxu1 %v644_v7  ;;  %284 = vmatpush.bf16.msra.mxu2 %v564_v19  ;;  %v540_v44 = vor.u32 %v654_v42, %v539_v41  ;;  %v544_v46 = vor.u32 %v653_v43, %v541_v45  ;;  %v531_v47 = vld [vmem:[#allocation4 + $0x20] sm:$0xf]  ;;  %v652_v48 = vld [vmem:[#allocation4 + $0x24] sm:$0xf0]  ;;  %v651_v49 = vld [vmem:[#allocation4 + $0x24] sm:$0xf] }
  0x19   :  { %298 = vmatpush.bf16.msra.mxu3 %v568_v20  ;;  %v532_v50 = vor.u32 %v652_v48, %v531_v47  ;;  %v533_v51 = vld [vmem:[#allocation4 + $0x28] sm:$0xf0]  ;;  %v523_v53 = vld [vmem:[#allocation4 + $0x10] sm:$0xf]  ;;  %v650_v54 = vld [vmem:[#allocation4 + $0x14] sm:$0xf0] }
  0x1a   :  { %v536_v52 = vor.u32 %v651_v49, %v533_v51  ;;  %v649_v55 = vld [vmem:[#allocation4 + $0x14] sm:$0xf]  ;;  %v524_v56 = vor.u32 %v650_v54, %v523_v53  ;;  %v525_v57 = vld [vmem:[#allocation4 + $0x18] sm:$0xf0]  ;;  %v515_v59 = vld [vmem:[#allocation4] sm:$0xf] }
  0x1b   :  { %v528_v58 = vor.u32 %v649_v55, %v525_v57  ;;  %v648_v60 = vld [vmem:[#allocation4 + $0x4] sm:$0xf0]  ;;  %v647_v61 = vld [vmem:[#allocation4 + $0x4] sm:$0xf]  ;;  %v517_v63 = vld [vmem:[#allocation4 + $0x8] sm:$0xf0] }
  0x1c   :  { %171 = vmatpush.bf16.msra.mxu1 %v643_v8  ;;  %285 = vmatpush.bf16.msra.mxu2 %v556_v25  ;;  %v516_v62 = vor.u32 %v648_v60, %v515_v59  ;;  %v520_v0 = vor.u32 %v647_v61, %v517_v63  ;;  %v670_v1 = vld [vmem:[#allocation6 + $0x38] sm:$0xff]  ;;  %v669_v3 = vld [vmem:[#allocation6 + $0x30] sm:$0xff]  ;;  %v668_v5 = vld [vmem:[#allocation6 + $0x28] sm:$0xff] }
  0x1d   :  { %299 = vmatpush.bf16.msra.mxu3 %v560_v26  ;;  %v678_v2 = vld [vmem:[#allocation6 + $0x78] sm:$0xff]  ;;  %449 = vmatpush.bf16.msrb.mxu0 %v670_v1  ;;  %v677_v4 = vld [vmem:[#allocation6 + $0x70] sm:$0xff]  ;;  %v676_v6 = vld [vmem:[#allocation6 + $0x68] sm:$0xff] }
  0x1e   :  { %v667_v7 = vld [vmem:[#allocation6 + $0x20] sm:$0xff]  ;;  %v666_v17 = vld [vmem:[#allocation6 + $0x18] sm:$0xff]  ;;  %v665_v19 = vld [vmem:[#allocation6 + $0x10] sm:$0xff] }
  0x1f   :  { %v675_v8 = vld [vmem:[#allocation6 + $0x60] sm:$0xff]  ;;  %v674_v18 = vld [vmem:[#allocation6 + $0x58] sm:$0xff]  ;;  %v673_v20 = vld [vmem:[#allocation6 + $0x50] sm:$0xff] }
  0x20   :  { %286 = vmatpush.bf16.msra.mxu2 %v548_v31  ;;  %463 = vmatpush.bf16.msrb.mxu1 %v678_v2  ;;  %v692_v10 = vld [vmem:[%s867_s4] ss:$0 sm:$0xff]  ;;  %v664_v21 = vld [vmem:[#allocation6 + $0x8] sm:$0xff] }
  0x21   :  { %300 = vmatpush.bf16.msra.mxu3 %v552_v32  ;;  %450 = vmatpush.bf16.msrb.mxu0 %v669_v3  ;;  %v672_v22 = vld [vmem:[#allocation6 + $0x48] sm:$0xff]  ;;  %v663_v23 = vld [vmem:[#allocation6] sm:$0xff] }
  0x22   :  { %v671_v24 = vld [vmem:[#allocation6 + $0x40] sm:$0xff] }
  0x23   :  { %v197_v25 = vld [vmem:[%s869_s6] sm:$0x3] }
  0x24   :  { %287 = vmatpush.bf16.msra.mxu2 %v540_v44  ;;  %464 = vmatpush.bf16.msrb.mxu1 %v677_v4  ;;  %v199_v28 = vperm.slane %v197_v25, 0  ;;  %v200_v29 = vperm.slane %v197_v25, 1  ;;  %v693_v44 = vld [vmem:[%s871_s8] ss:$0 sm:$0xff] }
  0x25   :  { %301 = vmatpush.bf16.msra.mxu3 %v544_v46  ;;  %451 = vmatpush.bf16.msrb.mxu0 %v668_v5 }
  0x28   :  { %288 = vmatpush.bf16.msra.mxu2 %v532_v50  ;;  %465 = vmatpush.bf16.msrb.mxu1 %v676_v6 }
  0x29   :  { %302 = vmatpush.bf16.msra.mxu3 %v536_v52  ;;  %452 = vmatpush.bf16.msrb.mxu0 %v667_v7 }
  0x2c   :  { %289 = vmatpush.bf16.msra.mxu2 %v524_v56  ;;  %466 = vmatpush.bf16.msrb.mxu1 %v675_v8 }
  0x2d   :  { %303 = vmatpush.bf16.msra.mxu3 %v528_v58  ;;  %453 = vmatpush.bf16.msrb.mxu0 %v666_v17 }
  0x30   :  { %290 = vmatpush.bf16.msra.mxu2 %v516_v62  ;;  %467 = vmatpush.bf16.msrb.mxu1 %v674_v18 }
  0x31   :  { %304 = vmatpush.bf16.msra.mxu3 %v520_v0  ;;  %454 = vmatpush.bf16.msrb.mxu0 %v665_v19 }
  0x34   :  { %468 = vmatpush.bf16.msrb.mxu1 %v673_v20 }
  0x35   :  { %455 = vmatpush.bf16.msrb.mxu0 %v664_v21 }
  0x38   :  { %469 = vmatpush.bf16.msrb.mxu1 %v672_v22 }
  0x39   :  { %456 = vmatpush.bf16.msrb.mxu0 %v663_v23 }
  0x3c   :  { %470 = vmatpush.bf16.msrb.mxu1 %v671_v24 }
  0x93   :  { %v116_v33 = vpop.f32.mrf.mxu0 }
  0x94   :  { %v117_v35 = vadd.f32 %v691_v34, %v116_v33 }
  0x96   :  { %v121_v38 = vmax.f32 %v117_v35, 0.0 }
  0x9b   :  { %v118_v36 = vpop.f32.mrf.mxu0 }
  0x9c   :  { %v119_v37 = vadd.f32 %v691_v34, %v118_v36 }
  0x9e   :  { %v122_v39 = vmax.f32 %v119_v37, 0.0 }
  0xa0   :  { %v123_v40 = vpack.c.bf16 %v122_v39, %v121_v38 }
  0xa2   :  { %512 = vmatmul.msk.bf16.vlgmr.msra.gmra.mxu1 %vm160_vm1, %v123_v40 }
 0x11f   :  { %v173_v9 = vpop.f32.mrf.mxu1 }
 0x120   :  { %v174_v11 = vadd.f32 %v692_v10, %v173_v9 }
 0x122   :  { %v178_v14 = vmax.f32 %v174_v11, 0.0 }
 0x127   :  { %v175_v12 = vpop.f32.mrf.mxu1 }
 0x128   :  { %v176_v13 = vadd.f32 %v692_v10, %v175_v12 }
 0x12a   :  { %v179_v15 = vmax.f32 %v176_v13, 0.0 }
 0x12c   :  { %v180_v16 = vpack.c.bf16 %v179_v15, %v178_v14 }
 0x12e   :  { %291 = vmatmul.bf16.vlgmr.msra.gmra.mxu2 %v180_v16  ;;  %305 = vmatmul.bf16.vlgmr.msra.gmra.mxu3 %v180_v16 }
 0x1b1   :  { %v292_v26 = vpop.f32.mrf.mxu2  ;;  %v306_v27 = vpop.f32.mrf.mxu3 }
 0x1b2   :  { %v293_v30 = vadd.f32 %v292_v26, %v199_v28  ;;  %v307_v31 = vadd.f32 %v306_v27, %v200_v29 }
 0x1b4   :  { %v311_v36 = vmax.f32 %v293_v30, 0.0  ;;  %v312_v37 = vmax.f32 %v307_v31, 0.0 }
 0x1b9   :  { %v294_v32 = vpop.f32.mrf.mxu2  ;;  %v308_v33 = vpop.f32.mrf.mxu3 }
 0x1ba   :  { %v295_v34 = vadd.f32 %v294_v32, %v199_v28  ;;  %v309_v35 = vadd.f32 %v308_v33, %v200_v29 }
 0x1bc   :  { %v313_v38 = vmax.f32 %v295_v34, 0.0  ;;  %v314_v39 = vmax.f32 %v309_v35, 0.0 }
 0x1be   :  { %v315_v40 = vpack.c.bf16 %v313_v38, %v311_v36  ;;  %v316_v41 = vpack.c.bf16 %v314_v39, %v312_v37 }
 0x1c0   :  { %457 = vmatmul.bf16.vlgmr.msrb.gmra.mxu0 %v315_v40  ;;  %471 = vmatmul.bf16.vlgmr.msrb.gmra.mxu1 %v316_v41 }
 0x23d   :  { %v458_v42 = vpop.f32.mrf.mxu0  ;;  %v472_v43 = vpop.f32.mrf.mxu1 }
 0x23e   :  { %v459_v45 = vadd.f32 %v693_v44, %v458_v42 }
 0x240   :  { %v473_v49 = vadd.f32 %v472_v43, %v459_v45 }
 0x245   :  { %v460_v46 = vpop.f32.mrf.mxu0  ;;  %v474_v48 = vpop.f32.mrf.mxu1 }
 0x246   :  { %v461_v47 = vadd.f32 %v693_v44, %v460_v46 }
 0x248   :  { %v475_v50 = vadd.f32 %v474_v48, %v461_v47 }
 0x24a   :  { %v682_v51 = vpack.c.bf16 %v475_v50, %v473_v49 }
 0x24c   :  { %683 = vst [vmem:[%s872_s9] sm:$0xff] %v682_v51  }
 0x24d   :  { %485 = vsyncpa [#allocation3], 1 }
 0x24e   :  { %486 = vsyncpa [#allocation5], 1 }

</bundles_post_ra>
